<compile_context>
chip_gen: v5e
topology: v5e:2x2
jax: 0.10.0
libtpu: 0.0.40
codegen_flags: <defaults>
</compile_context>

<pallas_src>
import functools

import jax
import jax.numpy as jnp
from jax.experimental import pallas as pl
from jax.experimental.pallas import tpu as pltpu

EPS = 1e-5
TOP = 8                      # sublane-aligned top padding of the row scratch


# ----------------------------- Pallas kernels ------------------------------


def _bn_finalize(o_ref, p_ref, gamma_ref, beta_ref, inv_cnt, relu):
    """Apply BatchNorm (+ optional ReLU) to the VMEM-resident pre-BN activation.

    o_ref holds the full (N, H, W*Cout) pre-BN activation.  Per-channel stats are
    obtained by reducing over (N, H) on sublanes and folding across the W lane
    groups with a 0/1 matmul P = kron(ones(W,W), I_Cout) (no lane relayouts).
    """
    y = o_ref[...]                                           # (N, H, WCo) f32
    n, h, wco = y.shape
    s = jnp.dot(y.reshape(n * h, wco), p_ref[...],
                preferred_element_type=jnp.float32)          # per-channel partial sums
    mean_row = jnp.sum(s, axis=0, keepdims=True) * inv_cnt   # (1, WCo), bcast across W
    centered = y - mean_row.reshape(1, 1, wco)
    s2 = jnp.dot((centered * centered).reshape(n * h, wco), p_ref[...],
                 preferred_element_type=jnp.float32)
    var_row = jnp.sum(s2, axis=0, keepdims=True) * inv_cnt   # centered variance
    scale = gamma_ref[...] * jax.lax.rsqrt(var_row + EPS)    # (1, WCo)
    out = centered * scale.reshape(1, 1, wco) + beta_ref[...].reshape(1, 1, wco)
    if relu:
        out = jnp.maximum(out, 0.0)
    o_ref[...] = out


def conv_bn_kernel(x_ref, w_ref, p_ref, gamma_ref, beta_ref, o_ref, xrows_ref, *,
                   K, dil, pad, H, W, Cin, Cout, Nb, relu, inv_cnt):
    """Banded conv (3x3 / 5x5 / dilated / sep / avg-pool+1x1) + fused BatchNorm.

    One wide-contraction MXU matmul per grid step:
      (Nb*H, K*W*Cin) @ (K*W*Cin, W*Cout), then BN finalize at the last step.
    """
    g = pl.program_id(0)
    WCi, WCo = W * Cin, W * Cout

    @pl.when(g == 0)
    def _():
        # Only the boundary rows need zeroing; they persist across grid steps.
        xrows_ref[:, TOP - pad:TOP, :] = jnp.zeros((Nb, pad, WCi), xrows_ref.dtype)
        xrows_ref[:, TOP + H:TOP + H + pad, :] = jnp.zeros((Nb, pad, WCi), xrows_ref.dtype)

    # Sublane-aligned interior store (row offset TOP == 8).
    xrows_ref[:, TOP:TOP + H, :] = x_ref[...]

    taps = [xrows_ref[:, TOP - pad + kh * dil:TOP - pad + kh * dil + H, :]
            .reshape(Nb * H, WCi) for kh in range(K)]
    rows_cat = jnp.concatenate(taps, axis=1)                 # (Nb*H, K*WCi)
    acc = jnp.dot(rows_cat, w_ref[...],
                  preferred_element_type=jnp.float32)        # (Nb*H, WCo)
    o_ref[pl.ds(g * Nb, Nb)] = acc.reshape(Nb, H, WCo)

    @pl.when(g == pl.num_programs(0) - 1)
    def _():
        _bn_finalize(o_ref, p_ref, gamma_ref, beta_ref, inv_cnt, relu)


def maxpool_bn_kernel(x_ref, wpw_ref, p_ref, gamma_ref, beta_ref, o_ref, xpad_ref, *,
                      H, W, Cin, Cout, Nb, inv_cnt):
    """3x3 stride-1 max pool (lane-dense taps) + block-diag 1x1 MXU matmul + BN."""
    g = pl.program_id(0)
    K, pad = 3, 1
    WCi, WCo = W * Cin, W * Cout

    @pl.when(g == 0)
    def _():
        # -inf padding (rows and W-columns); boundaries persist across grid steps.
        xpad_ref[...] = jnp.full(xpad_ref.shape, -jnp.inf, xpad_ref.dtype)

    xpad_ref[:, TOP:TOP + H, pad * Cin:pad * Cin + WCi] = x_ref[...]

    m = xpad_ref[:, TOP - pad:TOP - pad + H, 0:WCi]
    for kh in range(K):
        for kw in range(K):
            if kh == 0 and kw == 0:
                continue
            m = jnp.maximum(
                m, xpad_ref[:, TOP - pad + kh:TOP - pad + kh + H,
                            kw * Cin:kw * Cin + WCi])
    acc = jnp.dot(m.reshape(Nb * H, WCi), wpw_ref[...],
                  preferred_element_type=jnp.float32)        # (Nb*H, WCo)
    o_ref[pl.ds(g * Nb, Nb)] = acc.reshape(Nb, H, WCo)

    @pl.when(g == pl.num_programs(0) - 1)
    def _():
        _bn_finalize(o_ref, p_ref, gamma_ref, beta_ref, inv_cnt, relu=False)


# ------------------------------ JAX wrapper --------------------------------


def _banded_conv_weights(w4, dil, pad, W, Cin, Cout):
    """(K,K,Cin,Cout) -> (K, W*Cin, W*Cout) banded matrix (W padding folded in)."""
    K = w4.shape[0]
    diff = jnp.arange(W)[:, None] - jnp.arange(W)[None, :] + pad          # w_in - w_out + pad
    valid = (diff >= 0) & (diff % dil == 0) & (diff // dil < K)
    kw_idx = jnp.clip(diff // dil, 0, K - 1)
    g = w4[:, kw_idx, :, :]                                               # (K, W_in, W_out, Cin, Cout)
    g = jnp.where(valid[None, :, :, None, None], g, 0.0)
    g = jnp.transpose(g, (0, 1, 3, 2, 4)).reshape(K, W * Cin, W * Cout)
    return g.astype(jnp.bfloat16)


def _blockdiag_pw(wpw, W):
    """(Cin,Cout) -> kron(I_W, wpw): (W*Cin, W*Cout) block-diagonal 1x1 weight."""
    return jnp.kron(jnp.eye(W, dtype=wpw.dtype), wpw).astype(jnp.bfloat16)


def _fold_matrix(W, Cout):
    """kron(ones(W,W), I_Cout): folds lane-dense per-(w,c) sums into per-channel sums."""
    return jnp.kron(jnp.ones((W, W), jnp.float32), jnp.eye(Cout, dtype=jnp.float32))


def _bn_rows(gamma, beta, W, Cout):
    g = jnp.tile(gamma.reshape(-1), W).reshape(1, W * Cout).astype(jnp.float32)
    b = jnp.tile(beta.reshape(-1), W).reshape(1, W * Cout).astype(jnp.float32)
    return g, b


def _pick_nb(N, H):
    """Images per grid step: aim for >=128 matmul rows while dividing N."""
    target = max(1, 128 // max(H, 1))
    nb = 1
    for d in range(1, N + 1):
        if N % d == 0 and d * H <= 1024:
            nb = d
            if d >= target:
                break
    return nb


def _fused_call(kernel, x_ld, weights, N, H, W, Cin, Cout, Nb, scratch_shape):
    WCi, WCo = W * Cin, W * Cout
    in_specs = [pl.BlockSpec((Nb, H, WCi), lambda g: (g, 0, 0))]
    for wt in weights:
        in_specs.append(pl.BlockSpec(wt.shape, lambda g, _nd=wt.ndim: (0,) * _nd))
    # NOTE: the full (N, H, W*Cout) pre-BN activation stays VMEM-resident (constant
    # output index_map) so BN can be fused; fine for small NAS-cell shapes.
    return pl.pallas_call(
        kernel,
        grid=(N // Nb,),
        in_specs=in_specs,
        out_specs=pl.BlockSpec((N, H, WCo), lambda g: (0, 0, 0)),
        out_shape=jax.ShapeDtypeStruct((N, H, WCo), jnp.float32),
        scratch_shapes=[pltpu.VMEM(scratch_shape, jnp.bfloat16)],
        compiler_params=pltpu.CompilerParams(dimension_semantics=("arbitrary",)),
    )(x_ld, *weights)


def init_params(key, cin, cout):
    ks = jax.random.split(key, 13)

    def w(k, kh, kw, ci, co):
        fan_in = ci * kh * kw
        return jax.random.normal(k, (kh, kw, ci, co), jnp.float32) / jnp.sqrt(float(fan_in))

    def bn(k):
        g, b = jax.random.split(k)
        gamma = 1.0 + 0.1 * jax.random.normal(g, (1, cout), jnp.float32)
        beta = 0.1 * jax.random.normal(b, (1, cout), jnp.float32)
        return gamma, beta

    params = {}
    g, b = bn(ks[0]); params["conv3x3"] = {"w4": w(ks[1], 3, 3, cin, cout), "gamma": g, "beta": b}
    g, b = bn(ks[2]); params["conv5x5"] = {"w4": w(ks[3], 5, 5, cin, cout), "gamma": g, "beta": b}
    g, b = bn(ks[4]); params["sep_conv3x3"] = {"w4_dw": w(ks[5], 3, 3, 1, cin),
                                               "w4_pw": w(ks[6], 1, 1, cin, cout),
                                               "gamma": g, "beta": b}
    g, b = bn(ks[7]); params["dilated_conv3x3"] = {"w4": w(ks[8], 3, 3, cin, cout), "gamma": g, "beta": b}
    g, b = bn(ks[9]); params["avg_pool"] = {"w4_pw": w(ks[10], 1, 1, cin, cout), "gamma": g, "beta": b}
    g, b = bn(ks[11]); params["max_pool"] = {"w4_pw": w(ks[12], 1, 1, cin, cout), "gamma": g, "beta": b}
    return params


def mixed_op_forward(params, x_nchw, op_name):
    if op_name == "identity":
        return x_nchw.astype(jnp.float32)           # free: no transpose, no kernel

    # NCHW interface kept (module spec); transpose once to lane-dense (N, H, W*C).
    x = jnp.transpose(x_nchw.astype(jnp.bfloat16), (0, 2, 3, 1))
    N, H, W, Cin = x.shape
    x_ld = x.reshape(N, H, W * Cin)
    Nb = _pick_nb(N, H)
    p = params[op_name]
    inv_cnt = 1.0 / float(N * H * W)

    if op_name in ("conv3x3", "conv5x5", "dilated_conv3x3", "sep_conv3x3", "avg_pool"):
        if op_name == "conv3x3":
            w4, K, dil, pad, relu = p["w4"], 3, 1, 1, True
        elif op_name == "conv5x5":
            w4, K, dil, pad, relu = p["w4"], 5, 1, 2, True
        elif op_name == "dilated_conv3x3":
            w4, K, dil, pad, relu = p["w4"], 3, 2, 2, True
        elif op_name == "sep_conv3x3":
            # depthwise(3x3) then pointwise(1x1) are both linear -> one full conv.
            w4 = p["w4_dw"][:, :, 0, :, None] * p["w4_pw"][0, 0][None, None, :, :]
            K, dil, pad, relu = 3, 1, 1, True
        else:  # avg_pool: 3x3 mean (zero pad, /9) + 1x1 pointwise -> one full conv.
            w4 = jnp.tile((p["w4_pw"][0, 0] / 9.0)[None, None, :, :], (3, 3, 1, 1))
            K, dil, pad, relu = 3, 1, 1, False
        Cout = w4.shape[-1]
        bw = _banded_conv_weights(w4, dil, pad, W, Cin, Cout).reshape(K * W * Cin, W * Cout)
        gamma_row, beta_row = _bn_rows(p["gamma"], p["beta"], W, Cout)
        P = _fold_matrix(W, Cout)
        kern = functools.partial(conv_bn_kernel, K=K, dil=dil, pad=pad, H=H, W=W,
                                 Cin=Cin, Cout=Cout, Nb=Nb, relu=relu, inv_cnt=inv_cnt)
        out_ld = _fused_call(kern, x_ld, [bw, P, gamma_row, beta_row],
                             N, H, W, Cin, Cout, Nb,
                             scratch_shape=(Nb, TOP + H + pad, W * Cin))
    elif op_name == "max_pool":
        Cout = p["w4_pw"].shape[-1]
        wpw = _blockdiag_pw(p["w4_pw"].reshape(Cin, Cout), W)
        gamma_row, beta_row = _bn_rows(p["gamma"], p["beta"], W, Cout)
        P = _fold_matrix(W, Cout)
        kern = functools.partial(maxpool_bn_kernel, H=H, W=W, Cin=Cin, Cout=Cout,
                                 Nb=Nb, inv_cnt=inv_cnt)
        out_ld = _fused_call(kern, x_ld, [wpw, P, gamma_row, beta_row],
                             N, H, W, Cin, Cout, Nb,
                             scratch_shape=(Nb, TOP + H + 1, (W + 2) * Cin))
    else:
        raise ValueError(op_name)

    return jnp.transpose(out_ld.reshape(N, H, W, Cout), (0, 3, 1, 2))   # back to NCHW


# --------------------------- pure-JAX reference -----------------------------


def ref_forward(params, x_nchw, op_name):
    x = x_nchw.astype(jnp.float32)
    if op_name == "identity":
        return x
    p = params[op_name]

    def bn_act(y, gamma, beta, relu):
        mean = y.mean(axis=(0, 2, 3), keepdims=True)
        var = ((y - mean) ** 2).mean(axis=(0, 2, 3), keepdims=True)
        out = (y - mean) * jax.lax.rsqrt(var + EPS)
        out = out * gamma.reshape(1, -1, 1, 1) + beta.reshape(1, -1, 1, 1)
        return jnp.maximum(out, 0.0) if relu else out

    def conv(y, w, pad, dil=1, groups=1):
        return jax.lax.conv_general_dilated(
            y, w, (1, 1), [(pad, pad), (pad, pad)], rhs_dilation=(dil, dil),
            dimension_numbers=("NCHW", "HWIO", "NCHW"), feature_group_count=groups)

    if op_name == "conv3x3":
        return bn_act(conv(x, p["w4"], 1), p["gamma"], p["beta"], True)
    if op_name == "conv5x5":
        return bn_act(conv(x, p["w4"], 2), p["gamma"], p["beta"], True)
    if op_name == "dilated_conv3x3":
        return bn_act(conv(x, p["w4"], 2, dil=2), p["gamma"], p["beta"], True)
    if op_name == "sep_conv3x3":
        y = conv(x, p["w4_dw"], 1, groups=x.shape[1])
        y = conv(y, p["w4_pw"], 0)
        return bn_act(y, p["gamma"], p["beta"], True)
    if op_name == "avg_pool":
        y = jax.lax.reduce_window(x, 0.0, jax.lax.add, (1, 1, 3, 3), (1, 1, 1, 1),
                                  [(0, 0), (0, 0), (1, 1), (1, 1)]) / 9.0
        y = conv(y, p["w4_pw"], 0)
        return bn_act(y, p["gamma"], p["beta"], False)
    if op_name == "max_pool":
        y = jax.lax.reduce_window(x, -jnp.inf, jax.lax.max, (1, 1, 3, 3), (1, 1, 1, 1),
                                  [(0, 0), (0, 0), (1, 1), (1, 1)])
        y = conv(y, p["w4_pw"], 0)
        return bn_act(y, p["gamma"], p["beta"], False)
    raise ValueError(op_name)


# ---------------------------------- main ------------------------------------


if __name__ == "__main__":
    key = jax.random.PRNGKey(0)
    kx, kp = jax.random.split(key)

    # in_channels == out_channels so the 'identity' branch is valid (as in PyTorch).
    N, C, H, W = 2, 8, 16, 16
    x_nchw = jax.random.normal(kx, (N, C, H, W), jnp.float32)
    params = init_params(kp, C, C)

    fwd = jax.jit(mixed_op_forward, static_argnames="op_name")

    op_names = ["conv3x3", "conv5x5", "sep_conv3x3", "dilated_conv3x3",
                "avg_pool", "max_pool", "identity"]
    for op in op_names:
        out = fwd(params, x_nchw, op)
        out = jax.block_until_ready(out)
        ref = ref_forward(params, x_nchw, op)
        assert out.shape == ref.shape, (op, out.shape, ref.shape)
        # bf16 MXU inputs (f32 accumulation) -> relaxed tolerance vs f32 reference.
        assert jnp.allclose(out, ref, atol=2e-2, rtol=2e-2), f"mismatch for {op}"

    print("KERNEL_OK")
</pallas_src>

<mosaic_0001>
module attributes {stable_mosaic.version = 11 : i64} {
  func.func @conv_bn_kernel(%arg0: i32, %arg1: memref<2x16x128xbf16, #tpu.memory_space<vmem>>, %arg2: memref<384x128xbf16, #tpu.memory_space<vmem>>, %arg3: memref<128x128xf32, #tpu.memory_space<vmem>>, %arg4: memref<1x128xf32, #tpu.memory_space<vmem>>, %arg5: memref<1x128xf32, #tpu.memory_space<vmem>>, %arg6: memref<2x16x128xf32, #tpu.memory_space<vmem>>, %arg7: memref<2x25x128xbf16, #tpu.memory_space<vmem>>) attributes {dimension_semantics = [#tpu.dimension_semantics<arbitrary>], iteration_bounds = array<i64: 1>, scalar_prefetch = 0 : i64, scratch_operands = 1 : i64, tpu.core_type = #tpu.core_type<tc>, window_params = [{transform_indices = @transform_0, window_bounds = array<i64: 2, 16, 128>}, {pipeline_mode = #tpu.pipeline_mode<synchronous>, transform_indices = @transform_1, window_bounds = array<i64: 384, 128>}, {pipeline_mode = #tpu.pipeline_mode<synchronous>, transform_indices = @transform_2, window_bounds = array<i64: 128, 128>}, {pipeline_mode = #tpu.pipeline_mode<synchronous>, transform_indices = @transform_3, window_bounds = array<i64: 1, 128>}, {pipeline_mode = #tpu.pipeline_mode<synchronous>, transform_indices = @transform_4, window_bounds = array<i64: 1, 128>}, {pipeline_mode = #tpu.pipeline_mode<synchronous>, transform_indices = @transform_5, window_bounds = array<i64: 2, 16, 128>}]} {
    %c0_i32 = arith.constant 0 : i32
    %0 = arith.cmpi eq, %arg0, %c0_i32 : i32
    %1 = arith.extui %0 : i1 to i32
    %c0_i32_0 = arith.constant 0 : i32
    %2 = arith.cmpi ne, %1, %c0_i32_0 : i32
    scf.if %2 {
      %cst_18 = arith.constant 0.000000e+00 : bf16
      %21 = vector.broadcast %cst_18 : bf16 to vector<2x1x128xbf16>
      %c0_19 = arith.constant 0 : index
      %c7_20 = arith.constant 7 : index
      %c0_21 = arith.constant 0 : index
      %22 = vector.load %arg7[%c0_19, %c7_20, %c0_21] : memref<2x25x128xbf16, #tpu.memory_space<vmem>>, vector<2x1x128xbf16>
      tpu.vector_store %arg7[%c0_19, %c7_20, %c0_21], %21 {strides = array<i32>} : memref<2x25x128xbf16, #tpu.memory_space<vmem>>, vector<2x1x128xbf16>,
      %cst_22 = arith.constant 0.000000e+00 : bf16
      %23 = vector.broadcast %cst_22 : bf16 to vector<2x1x128xbf16>
      %c0_23 = arith.constant 0 : index
      %c24 = arith.constant 24 : index
      %c0_24 = arith.constant 0 : index
      %24 = vector.load %arg7[%c0_23, %c24, %c0_24] : memref<2x25x128xbf16, #tpu.memory_space<vmem>>, vector<2x1x128xbf16>
      tpu.vector_store %arg7[%c0_23, %c24, %c0_24], %23 {strides = array<i32>} : memref<2x25x128xbf16, #tpu.memory_space<vmem>>, vector<2x1x128xbf16>,
    } else {
    }
    %c0 = arith.constant 0 : index
    %c0_1 = arith.constant 0 : index
    %c0_2 = arith.constant 0 : index
    %3 = vector.load %arg1[%c0, %c0_1, %c0_2] : memref<2x16x128xbf16, #tpu.memory_space<vmem>>, vector<2x16x128xbf16>
    %c0_3 = arith.constant 0 : index
    %c8 = arith.constant 8 : index
    %c0_4 = arith.constant 0 : index
    %4 = vector.load %arg7[%c0_3, %c8, %c0_4] : memref<2x25x128xbf16, #tpu.memory_space<vmem>>, vector<2x16x128xbf16>
    tpu.vector_store %arg7[%c0_3, %c8, %c0_4], %3 {strides = array<i32>} : memref<2x25x128xbf16, #tpu.memory_space<vmem>>, vector<2x16x128xbf16>,
    %c0_5 = arith.constant 0 : index
    %c7 = arith.constant 7 : index
    %c0_6 = arith.constant 0 : index
    %5 = vector.load %arg7[%c0_5, %c7, %c0_6] : memref<2x25x128xbf16, #tpu.memory_space<vmem>>, vector<2x16x128xbf16>
    %6 = vector.shape_cast %5 : vector<2x16x128xbf16> to vector<32x128xbf16>
    %c0_7 = arith.constant 0 : index
    %c8_8 = arith.constant 8 : index
    %c0_9 = arith.constant 0 : index
    %7 = vector.load %arg7[%c0_7, %c8_8, %c0_9] : memref<2x25x128xbf16, #tpu.memory_space<vmem>>, vector<2x16x128xbf16>
    %8 = vector.shape_cast %7 : vector<2x16x128xbf16> to vector<32x128xbf16>
    %c0_10 = arith.constant 0 : index
    %c9 = arith.constant 9 : index
    %c0_11 = arith.constant 0 : index
    %9 = vector.load %arg7[%c0_10, %c9, %c0_11] : memref<2x25x128xbf16, #tpu.memory_space<vmem>>, vector<2x16x128xbf16>
    %10 = vector.shape_cast %9 : vector<2x16x128xbf16> to vector<32x128xbf16>
    %11 = tpu.concatenate %6, %8, %10 in 1 : vector<32x128xbf16>, vector<32x128xbf16>, vector<32x128xbf16> -> vector<32x384xbf16>
    %c0_12 = arith.constant 0 : index
    %c0_13 = arith.constant 0 : index
    %12 = vector.load %arg2[%c0_12, %c0_13] : memref<384x128xbf16, #tpu.memory_space<vmem>>, vector<384x128xbf16>
    %cst = arith.constant dense<0.000000e+00> : vector<32x128xf32>
    %13 = tpu.matmul %11, %12, %cst {dimension_numbers = #tpu.dot_dimension_numbers<[1], [0], [0], [1], [0, 0, 1, 1], [], []>} : vector<32x384xbf16>, vector<384x128xbf16>, vector<32x128xf32> -> vector<32x128xf32>
    %14 = vector.shape_cast %13 : vector<32x128xf32> to vector<2x16x128xf32>
    %c2_i32 = arith.constant 2 : i32
    %15 = arith.muli %arg0, %c2_i32 : i32
    %16 = arith.index_cast %15 : i32 to index
    %c0_14 = arith.constant 0 : index
    %c0_15 = arith.constant 0 : index
    %17 = vector.load %arg6[%16, %c0_14, %c0_15] : memref<2x16x128xf32, #tpu.memory_space<vmem>>, vector<2x16x128xf32>
    tpu.vector_store %arg6[%16, %c0_14, %c0_15], %14 {strides = array<i32>} : memref<2x16x128xf32, #tpu.memory_space<vmem>>, vector<2x16x128xf32>,
    %c0_i32_16 = arith.constant 0 : i32
    %18 = arith.cmpi eq, %arg0, %c0_i32_16 : i32
    %19 = arith.extui %18 : i1 to i32
    %c0_i32_17 = arith.constant 0 : i32
    %20 = arith.cmpi ne, %19, %c0_i32_17 : i32
    scf.if %20 {
      %c0_18 = arith.constant 0 : index
      %c0_19 = arith.constant 0 : index
      %c0_20 = arith.constant 0 : index
      %21 = vector.load %arg6[%c0_18, %c0_19, %c0_20] : memref<2x16x128xf32, #tpu.memory_space<vmem>>, vector<2x16x128xf32>
      %22 = vector.shape_cast %21 : vector<2x16x128xf32> to vector<32x128xf32>
      %c0_21 = arith.constant 0 : index
      %c0_22 = arith.constant 0 : index
      %23 = vector.load %arg3[%c0_21, %c0_22] : memref<128x128xf32, #tpu.memory_space<vmem>>, vector<128x128xf32>
      %cst_23 = arith.constant dense<0.000000e+00> : vector<32x128xf32>
      %24 = tpu.matmul %22, %23, %cst_23 {dimension_numbers = #tpu.dot_dimension_numbers<[1], [0], [0], [1], [0, 0, 1, 1], [], []>} : vector<32x128xf32>, vector<128x128xf32>, vector<32x128xf32> -> vector<32x128xf32>
      %cst_24 = arith.constant dense<0.000000e+00> : vector<128xf32>
      %25 = vector.multi_reduction <add>, %24, %cst_24 [0] : vector<32x128xf32> to vector<128xf32>
      %26 = vector.shape_cast %25 : vector<128xf32> to vector<1x128xf32>
      %cst_25 = arith.constant 0.001953125 : f32
      %27 = vector.broadcast %cst_25 : f32 to vector<1x128xf32>
      %28 = arith.mulf %26, %27 : vector<1x128xf32>
      %29 = vector.shape_cast %28 : vector<1x128xf32> to vector<1x1x128xf32>
      %30 = vector.broadcast %29 : vector<1x1x128xf32> to vector<2x16x128xf32>
      %31 = arith.subf %21, %30 : vector<2x16x128xf32>
      %32 = arith.mulf %31, %31 : vector<2x16x128xf32>
      %33 = vector.shape_cast %32 : vector<2x16x128xf32> to vector<32x128xf32>
      %c0_26 = arith.constant 0 : index
      %c0_27 = arith.constant 0 : index
      %34 = vector.load %arg3[%c0_26, %c0_27] : memref<128x128xf32, #tpu.memory_space<vmem>>, vector<128x128xf32>
      %cst_28 = arith.constant dense<0.000000e+00> : vector<32x128xf32>
      %35 = tpu.matmul %33, %34, %cst_28 {dimension_numbers = #tpu.dot_dimension_numbers<[1], [0], [0], [1], [0, 0, 1, 1], [], []>} : vector<32x128xf32>, vector<128x128xf32>, vector<32x128xf32> -> vector<32x128xf32>
      %cst_29 = arith.constant dense<0.000000e+00> : vector<128xf32>
      %36 = vector.multi_reduction <add>, %35, %cst_29 [0] : vector<32x128xf32> to vector<128xf32>
      %37 = vector.shape_cast %36 : vector<128xf32> to vector<1x128xf32>
      %cst_30 = arith.constant 0.001953125 : f32
      %38 = vector.broadcast %cst_30 : f32 to vector<1x128xf32>
      %39 = arith.mulf %37, %38 : vector<1x128xf32>
      %c0_31 = arith.constant 0 : index
      %c0_32 = arith.constant 0 : index
      %40 = vector.load %arg4[%c0_31, %c0_32] : memref<1x128xf32, #tpu.memory_space<vmem>>, vector<1x128xf32>
      %cst_33 = arith.constant 9.99999974E-6 : f32
      %41 = vector.broadcast %cst_33 : f32 to vector<1x128xf32>
      %42 = arith.addf %39, %41 : vector<1x128xf32>
      %43 = math.rsqrt %42 : vector<1x128xf32>
      %44 = arith.mulf %40, %43 : vector<1x128xf32>
      %45 = vector.shape_cast %44 : vector<1x128xf32> to vector<1x1x128xf32>
      %46 = vector.broadcast %45 : vector<1x1x128xf32> to vector<2x16x128xf32>
      %47 = arith.mulf %31, %46 : vector<2x16x128xf32>
      %c0_34 = arith.constant 0 : index
      %c0_35 = arith.constant 0 : index
      %48 = vector.load %arg5[%c0_34, %c0_35] : memref<1x128xf32, #tpu.memory_space<vmem>>, vector<1x128xf32>
      %49 = vector.shape_cast %48 : vector<1x128xf32> to vector<1x1x128xf32>
      %50 = vector.broadcast %49 : vector<1x1x128xf32> to vector<2x16x128xf32>
      %51 = arith.addf %47, %50 : vector<2x16x128xf32>
      %cst_36 = arith.constant 0.000000e+00 : f32
      %52 = vector.broadcast %cst_36 : f32 to vector<2x16x128xf32>
      %53 = arith.maximumf %51, %52 : vector<2x16x128xf32>
      %c0_37 = arith.constant 0 : index
      %c0_38 = arith.constant 0 : index
      %c0_39 = arith.constant 0 : index
      %54 = vector.load %arg6[%c0_37, %c0_38, %c0_39] : memref<2x16x128xf32, #tpu.memory_space<vmem>>, vector<2x16x128xf32>
      tpu.vector_store %arg6[%c0_37, %c0_38, %c0_39], %53 {strides = array<i32>} : memref<2x16x128xf32, #tpu.memory_space<vmem>>, vector<2x16x128xf32>,
    } else {
    }
    return
  }
  func.func @transform_0(%arg0: i32) -> (i32, i32, i32) {
    %c0_i32 = arith.constant 0 : i32
    %c0_i32_0 = arith.constant 0 : i32
    %c0_i32_1 = arith.constant 0 : i32
    return %arg0, %c0_i32, %c0_i32_0 : i32, i32, i32
  }
  func.func @transform_1(%arg0: i32) -> (i32, i32) {
    %c0_i32 = arith.constant 0 : i32
    %c0_i32_0 = arith.constant 0 : i32
    %c0_i32_1 = arith.constant 0 : i32
    return %c0_i32, %c0_i32_0 : i32, i32
  }
  func.func @transform_2(%arg0: i32) -> (i32, i32) {
    %c0_i32 = arith.constant 0 : i32
    %c0_i32_0 = arith.constant 0 : i32
    %c0_i32_1 = arith.constant 0 : i32
    return %c0_i32, %c0_i32_0 : i32, i32
  }
  func.func @transform_3(%arg0: i32) -> (i32, i32) {
    %c0_i32 = arith.constant 0 : i32
    %c0_i32_0 = arith.constant 0 : i32
    %c0_i32_1 = arith.constant 0 : i32
    return %c0_i32, %c0_i32_0 : i32, i32
  }
  func.func @transform_4(%arg0: i32) -> (i32, i32) {
    %c0_i32 = arith.constant 0 : i32
    %c0_i32_0 = arith.constant 0 : i32
    %c0_i32_1 = arith.constant 0 : i32
    return %c0_i32, %c0_i32_0 : i32, i32
  }
  func.func @transform_5(%arg0: i32) -> (i32, i32, i32) {
    %c0_i32 = arith.constant 0 : i32
    %c0_i32_0 = arith.constant 0 : i32
    %c0_i32_1 = arith.constant 0 : i32
    %c0_i32_2 = arith.constant 0 : i32
    return %c0_i32, %c0_i32_0, %c0_i32_1 : i32, i32, i32
  }
}

</mosaic_0001>

<bundles_post_ra>
// kernel: tile.10
= control target key start
LH: loop header
LB: loop body
LE: loop exit
PB: predicated region body
PF: predicated region fallthrough
CT: control target
= control target key end

     0   :  { %s28_s0 = inlined_call_operand.vmem [shape: f32[8], index: 0, kind: input, shape index: {}]   ;;  %s29_s1 = inlined_call_operand.vmem [shape: f32[16,8], index: 1, kind: output, shape index: {}]  }
   0x1   :  { %v4_v0 = vld [vmem:[%s28_s0] ss:$0 sm:$0xff] }
   0x2   :  { %5 = vst [vmem:[%s29_s1] sm:$0xff] %v4_v0 }
   0x3   :  { %8 = vst [vmem:[%s29_s1 + $0x8] sm:$0xff] %v4_v0 }

// kernel: tile.11
= control target key start
LH: loop header
LB: loop body
LE: loop exit
PB: predicated region body
PF: predicated region fallthrough
CT: control target
= control target key end

     0   :  { %s131_s10 = smov 120   ;;  %s132_s11 = smov 104   ;;  %vm3_vm0 = vcmask 64512   ;;  %vm9_vm1 = vcmask 1048512   ;;  %vm15_vm2 = vcmask 982912   ;;  %vm21_vm3 = vcmask 917312   ;;  %s207_s0 = inlined_call_operand.vmem [shape: f32[16,8], index: 0, kind: input, shape index: {}]   ;;  %s208_s1 = inlined_call_operand.vmem [shape: f32[1,128], index: 1, kind: output, shape index: {}]  }
   0x1   :  { %v101_v0 = vld [vmem:[%s207_s0 + $0xf] sm:$0x1]   ;;  %v103_v1 = vld [vmem:[%s207_s0 + $0xd] sm:$0x1]   ;;  %v105_v2 = vld [vmem:[%s207_s0 + $0xb] sm:$0x1]  }
   0x2   :  { %7 = vrot.lane.b32.xlu0 %v101_v0, %s131_s10  ;;  %19 = vrot.lane.b32.xlu1 %v103_v1, %s132_s11  ;;  %s133_s14 = smov 88   ;;  %v102_v3 = vld [vmem:[%s207_s0 + $0xe] sm:$0x1]   ;;  %v104_v4 = vld [vmem:[%s207_s0 + $0xc] sm:$0x1]   ;;  %s134_s19 = smov 112  }
   0x3   :  { %31 = vrot.lane.b32.xlu2 %v105_v2, %s133_s14  ;;  %s135_s20 = smov 96   ;;  %v106_v5 = vld [vmem:[%s207_s0 + $0xa] sm:$0x1]   ;;  %s136_s23 = smov 80   ;;  %v107_v6 = vld [vmem:[%s207_s0 + $0x9] sm:$0x1]  }
   0x4   :  { %v108_v7 = vld [vmem:[%s207_s0 + $0x8] sm:$0x1]   ;;  %s137_s28 = smov 72   ;;  %s138_s29 = smov 64   ;;  %v109_v8 = vld [vmem:[%s207_s0 + $0x7] sm:$0x1]  }
   0x5   :  { %s139_s3 = smov 56   ;;  %v110_v9 = vld [vmem:[%s207_s0 + $0x6] sm:$0x1]   ;;  %v111_v10 = vld [vmem:[%s207_s0 + $0x5] sm:$0x1]   ;;  %s140_s8 = smov 48  }
   0x6   :  { %s141_s9 = smov 40   ;;  %v112_v11 = vld [vmem:[%s207_s0 + $0x4] sm:$0x1]   ;;  %s142_s12 = smov 32   ;;  %v113_v12 = vld [vmem:[%s207_s0 + $0x3] sm:$0x1]  }
   0x7   :  { %v114_v13 = vld [vmem:[%s207_s0 + $0x2] sm:$0x1]   ;;  %s143_s17 = smov 24   ;;  %s144_s18 = smov 16   ;;  %v115_v14 = vld [vmem:[%s207_s0 + $0x1] sm:$0x1]  }
   0x8   :  { %s145_s21 = smov 8   ;;  %v2_v15 = vld [vmem:[%s207_s0] sm:$0x1]   ;;  %vm27_vm4 = vcmask 851712   ;;  %vm33_vm5 = vcmask 786112   ;;  %vm39_vm6 = vcmask 720512  }
   0x9   :  { %4 = vst.msk [vmem:[#allocation0] sm:$0x1] %vm3_vm0, %v2_v15   ;;  %vm45_vm7 = vcmask 654912   ;;  %vm51_vm8 = vcmask 589312   ;;  %vm57_vm9 = vcmask 523712   ;;  %vm63_vm10 = vcmask 458112  }
   0xa   :  { %13 = vrot.lane.b32.xlu0 %v102_v3, %s134_s19  ;;  %25 = vrot.lane.b32.xlu1 %v104_v4, %s135_s20  ;;  %vm69_vm11 = vcmask 392512   ;;  %vm75_vm12 = vcmask 326912   ;;  %vm81_vm13 = vcmask 261312   ;;  %vm87_vm14 = vcmask 195712  }
   0xb   :  { %37 = vrot.lane.b32.xlu2 %v106_v5, %s136_s23  ;;  %vm93_vm15 = vcmask 130112  }
  0x12   :  { %43 = vrot.lane.b32.xlu0 %v107_v6, %s137_s28  ;;  %49 = vrot.lane.b32.xlu1 %v108_v7, %s138_s29 }
  0x13   :  { %55 = vrot.lane.b32.xlu2 %v109_v8, %s139_s3 }
  0x1a   :  { %61 = vrot.lane.b32.xlu0 %v110_v9, %s140_s8  ;;  %67 = vrot.lane.b32.xlu1 %v111_v10, %s141_s9 }
  0x1b   :  { %73 = vrot.lane.b32.xlu2 %v112_v11, %s142_s12 }
  0x22   :  { %79 = vrot.lane.b32.xlu0 %v113_v12, %s143_s17  ;;  %85 = vrot.lane.b32.xlu1 %v114_v13, %s144_s18 }
  0x23   :  { %91 = vrot.lane.b32.xlu2 %v115_v14, %s145_s21 }
  0x5d   :  { %v32_v16 = vpop.permute.xlu2 %31  }
  0x65   :  { %v38_v17 = vpop.permute.xlu2 %37  }
  0x6d   :  { %v56_v18 = vpop.permute.xlu2 %55  }
  0x74   :  { %v8_v19 = vpop.permute.xlu0 %7   ;;  %v20_v20 = vpop.permute.xlu1 %19  }
  0x75   :  { %10 = vst.msk [vmem:[#allocation0] sm:$0x1] %vm9_vm1, %v8_v19   ;;  %v74_v21 = vpop.permute.xlu2 %73  }
  0x7c   :  { %v14_v22 = vpop.permute.xlu0 %13   ;;  %v26_v23 = vpop.permute.xlu1 %25  }
  0x7d   :  { %16 = vst.msk [vmem:[#allocation0] sm:$0x1] %vm15_vm2, %v14_v22   ;;  %v92_v24 = vpop.permute.xlu2 %91  }
  0x7e   :  { %22 = vst.msk [vmem:[#allocation0] sm:$0x1] %vm21_vm3, %v20_v20  }
  0x7f   :  { %28 = vst.msk [vmem:[#allocation0] sm:$0x1] %vm27_vm4, %v26_v23  }
  0x80   :  { %34 = vst.msk [vmem:[#allocation0] sm:$0x1] %vm33_vm5, %v32_v16  }
  0x81   :  { %40 = vst.msk [vmem:[#allocation0] sm:$0x1] %vm39_vm6, %v38_v17  }
  0x84   :  { %v44_v25 = vpop.permute.xlu0 %43   ;;  %v50_v26 = vpop.permute.xlu1 %49  }
  0x85   :  { %46 = vst.msk [vmem:[#allocation0] sm:$0x1] %vm45_vm7, %v44_v25  }
  0x86   :  { %52 = vst.msk [vmem:[#allocation0] sm:$0x1] %vm51_vm8, %v50_v26  }
  0x87   :  { %58 = vst.msk [vmem:[#allocation0] sm:$0x1] %vm57_vm9, %v56_v18  }
  0x8c   :  { %v62_v27 = vpop.permute.xlu0 %61   ;;  %v68_v28 = vpop.permute.xlu1 %67  }
  0x8d   :  { %64 = vst.msk [vmem:[#allocation0] sm:$0x1] %vm63_vm10, %v62_v27  }
  0x8e   :  { %70 = vst.msk [vmem:[#allocation0] sm:$0x1] %vm69_vm11, %v68_v28  }
  0x8f   :  { %76 = vst.msk [vmem:[#allocation0] sm:$0x1] %vm75_vm12, %v74_v21  }
  0x94   :  { %v80_v29 = vpop.permute.xlu0 %79   ;;  %v86_v30 = vpop.permute.xlu1 %85  }
  0x95   :  { %82 = vst.msk [vmem:[#allocation0] sm:$0x1] %vm81_vm13, %v80_v29  }
  0x96   :  { %88 = vst.msk [vmem:[#allocation0] sm:$0x1] %vm87_vm14, %v86_v30  }
  0x97   :  { %94 = vst.msk [vmem:[#allocation0] sm:$0x1] %vm93_vm15, %v92_v24  }
  0x9e   :  { %v97_v31 = vld [vmem:[#allocation0] sm:$0x1] }
  0x9f   :  { %100 = vst [vmem:[%s208_s1] sm:$0x1] %v97_v31 }

// kernel: mixed_op_forward.1
= control target key start
LH: loop header
LB: loop body
LE: loop exit
PB: predicated region body
PF: predicated region fallthrough
CT: control target
= control target key end

     0   :  { %vm25_vm0 = vcmask 1043459   ;;  %vm26_vm1 = vsmask.f32 7950  ;;  %v28_v6 = vld [vmem:[#allocation2] sm:$0x8]  ;;  %vm34_vm2 = vcmask 1040384   ;;  %s1017_s1 = inlined_call_operand.vmem [shape: bf16[384,128], index: 1, kind: input, shape index: {}]   ;;  %s1018_s0 = inlined_call_operand.vmem [shape: bf16[2,16,128], index: 0, kind: input, shape index: {}]   ;;  %s1019_s2 = inlined_call_operand.vmem [shape: f32[128,128], index: 2, kind: input, shape index: {}]   ;;  %s1020_s4 = inlined_call_operand.vmem [shape: f32[1,128], index: 4, kind: input, shape index: {}]   ;;  %s1021_s3 = inlined_call_operand.vmem [shape: f32[1,128], index: 3, kind: input, shape index: {}]   ;;  %s1022_s5 = inlined_call_operand.vmem [shape: f32[2,16,128], index: 5, kind: output, shape index: {}]  }
   0x1   :  { %v685_v0 = vld [vmem:[%s1017_s1 + $0x38] sm:$0xff]  ;;  %v684_v3 = vld [vmem:[%s1017_s1 + $0x30] sm:$0xff]  ;;  %v683_v7 = vld [vmem:[%s1017_s1 + $0x28] sm:$0xff]  ;;  %vm35_vm3 = vsmask.f32 256 }
   0x2   :  { %v693_v1 = vld [vmem:[%s1017_s1 + $0x78] sm:$0xff]  ;;  %357 = vmatpush.bf16.msra.mxu0 %v685_v0  ;;  %v692_v4 = vld [vmem:[%s1017_s1 + $0x70] sm:$0xff]  ;;  %v691_v8 = vld [vmem:[%s1017_s1 + $0x68] sm:$0xff]  ;;  %vm58_vm6 = vsmask.f32 4368 }
   0x3   :  { %v701_v2 = vld [vmem:[%s1017_s1 + $0xb8] sm:$0xff]  ;;  %376 = vmatpush.bf16.msra.mxu1 %v693_v1  ;;  %v700_v5 = vld [vmem:[%s1017_s1 + $0xb0] sm:$0xff]  ;;  %v699_v9 = vld [vmem:[%s1017_s1 + $0xa8] sm:$0xff]  ;;  %vm106_vm7 = vsmask.f32 3328 }
   0x4   :  { %395 = vmatpush.bf16.msra.mxu2 %v701_v2  ;;  %vm810_vm4 = vmand %vm25_vm0, %vm26_vm1  ;;  %v37_v11 = vld [vmem:[#allocation2 + $0xc] sm:$0x1]  ;;  %v40_v12 = vld [vmem:[#allocation2 + $0x1c] sm:$0x1]  ;;  %vm107_vm8 = vsmask.f32 7440 }
   0x5   :  { %v682_v13 = vld [vmem:[%s1017_s1 + $0x20] sm:$0xff]  ;;  %v29_v14 = vsel %vm810_vm4, 0, %v28_v6  ;;  %vm36_vm5 = vmand %vm34_vm2, %vm35_vm3  ;;  %v31_v15 = vld [vmem:[#allocation2 + $0x10] sm:$0x8] }
   0x6   :  { %358 = vmatpush.bf16.msra.mxu0 %v684_v3  ;;  %v690_v16 = vld [vmem:[%s1017_s1 + $0x60] sm:$0xff]  ;;  %30 = vst [vmem:[#allocation2] sm:$0x8] %v29_v14  ;;  %v38_v17 = vsel %vm36_vm5, 0, %v37_v11  ;;  %v41_v18 = vsel %vm36_vm5, 0, %v40_v12  ;;  %v32_v21 = vsel %vm810_vm4, 0, %v31_v15  ;;  %vm882_vm9 = vmor %vm35_vm3, %vm58_vm6 }
   0x7   :  { %377 = vmatpush.bf16.msra.mxu1 %v692_v4  ;;  %v43_v19 = vld [vmem:[%s1018_s0] sm:$0xff]   ;;  %39 = vst [vmem:[#allocation2 + $0xc] sm:$0x1] %v38_v17  ;;  %v45_v22 = vld [vmem:[%s1018_s0 + $0x8] sm:$0xff]   ;;  %v681_v23 = vld [vmem:[%s1017_s1 + $0x18] sm:$0xff] }
   0x8   :  { %396 = vmatpush.bf16.msra.mxu2 %v700_v5  ;;  %v698_v20 = vld [vmem:[%s1017_s1 + $0xa0] sm:$0xff]  ;;  %42 = vst [vmem:[#allocation2 + $0x1c] sm:$0x1] %v41_v18  ;;  %v689_v24 = vld [vmem:[%s1017_s1 + $0x58] sm:$0xff]  ;;  %v680_v27 = vld [vmem:[%s1017_s1 + $0x10] sm:$0xff] }
   0x9   :  { %47 = vst [vmem:[#allocation2 + $0x4] sm:$0xff] %v43_v19   ;;  %v697_v25 = vld [vmem:[%s1017_s1 + $0x98] sm:$0xff]  ;;  %v688_v28 = vld [vmem:[%s1017_s1 + $0x50] sm:$0xff]  ;;  %v679_v40 = vld [vmem:[%s1017_s1 + $0x8] sm:$0xff] }
   0xa   :  { %359 = vmatpush.bf16.msra.mxu0 %v683_v7  ;;  %33 = vst [vmem:[#allocation2 + $0x10] sm:$0x8] %v32_v21  ;;  %v696_v30 = vld [vmem:[%s1017_s1 + $0x90] sm:$0xff]  ;;  %v855_v32 = vld [vmem:[%s1019_s2 + $0x78] sm:$0xff]  ;;  %v687_v41 = vld [vmem:[%s1017_s1 + $0x48] sm:$0xff] }
   0xb   :  { %378 = vmatpush.bf16.msra.mxu1 %v691_v8  ;;  %49 = vst [vmem:[#allocation2 + $0x14] sm:$0xff] %v45_v22   ;;  %444 = vmatpush.msra.mxu3 %v855_v32  ;;  %v861_v35 = vld [vmem:[%s1019_s2 + $0x70] sm:$0xff]  ;;  %v695_v45 = vld [vmem:[%s1017_s1 + $0x88] sm:$0xff]  ;;  %v890_v56 = vld [vmem:[%s1019_s2 + $0x60] sm:$0xff] }
   0xc   :  { %397 = vmatpush.bf16.msra.mxu2 %v699_v9  ;;  %v878_v50 = vld [vmem:[%s1019_s2 + $0x68] sm:$0xff]  ;;  %v678_v57 = vld [vmem:[%s1017_s1] sm:$0xff]  ;;  %vm901_vm10 = vmor %vm106_vm7, %vm107_vm8 }
   0xd   :  { %v51_v26 = vld [vmem:[#allocation2] sm:$0x8]  ;;  %445 = vmatpush.msra.mxu3 %v861_v35  ;;  %v909_v4 = vld [vmem:[%s1019_s2 + $0x58] sm:$0xff]  ;;  %v922_v14 = vld [vmem:[%s1019_s2 + $0x50] sm:$0xff] }
   0xe   :  { %360 = vmatpush.bf16.msra.mxu0 %v682_v13  ;;  %v61_v29 = vshrl.u32 %v51_v26, 16  ;;  %v104_v31 = vld [vmem:[#allocation2 + $0xc] sm:$0x1]  ;;  %v686_v58 = vld [vmem:[%s1017_s1 + $0x40] sm:$0xff] }
   0xf   :  { %379 = vmatpush.bf16.msra.mxu1 %v690_v16  ;;  %v119_v43 = vshll.u32 %v104_v31, 16  ;;  %446 = vmatpush.msra.mxu3 %v878_v50  ;;  %v694_v5 = vld [vmem:[%s1017_s1 + $0x80] sm:$0xff]  ;;  %v105_v19 = vld [vmem:[#allocation2 + $0x1c] sm:$0x1]  ;;  %v429_v63 = vld [vmem:[%s1019_s2 + $0x8] sm:$0xff] }
  0x10   :  { %398 = vmatpush.bf16.msra.mxu2 %v698_v20  ;;  %v52_v33 = vld [vmem:[#allocation2 + $0x4] sm:$0xf]  ;;  %v53_v34 = vld [vmem:[#allocation2 + $0x8] sm:$0xf]  ;;  %v570_v42 = vrot.slane %v61_v29, 11 }
  0x11   :  { %v66_v36 = vshrl.u32 %v52_v33, 16  ;;  %v69_v37 = vshll.u32 %v52_v33, 16  ;;  %v75_v38 = vshrl.u32 %v53_v34, 16  ;;  %v78_v39 = vshll.u32 %v53_v34, 16  ;;  %v54_v2 = vld [vmem:[#allocation2 + $0x10] sm:$0x8]  ;;  %447 = vmatpush.msra.mxu3 %v890_v56 }
  0x12   :  { %361 = vmatpush.bf16.msra.mxu0 %v681_v23  ;;  %v869_v44 = vld [vmem:[#allocation2 + $0x14] sm:$0xf]  ;;  %v56_v54 = vld [vmem:[#allocation2 + $0x18] sm:$0xf]  ;;  %v121_v1 = vrot.slane %v119_v43, 5  ;;  %v676_v15 = vld [vmem:[#allocation2 + $0x4] sm:$0xff] }
  0x13   :  { %380 = vmatpush.bf16.msra.mxu1 %v689_v24  ;;  %v68_v46 = vrot.slane %v66_v36, 7  ;;  %v77_v47 = vrot.slane %v75_v38, 7  ;;  %v109_v48 = vrot.slane %v66_v36, 4  ;;  %v110_v49 = vrot.slane %v69_v37, 5  ;;  %448 = vmatpush.msra.mxu3 %v909_v4 }
  0x14   :  { %399 = vmatpush.bf16.msra.mxu2 %v697_v25  ;;  %v113_v52 = vrot.slane %v78_v39, 5  ;;  %v115_v53 = vrot.slane %v75_v38, 4  ;;  %v88_v55 = vshrl.u32 %v869_v44, 16  ;;  %v91_v3 = vshll.u32 %v869_v44, 16 }
  0x15   :  { %v71_v59 = vor.u32 %v69_v37, %v68_v46  ;;  %v73_v60 = vrot.slane %v68_v46, 4  ;;  %v80_v61 = vor.u32 %v78_v39, %v77_v47  ;;  %v111_v62 = vor.u32 %v110_v49, %v109_v48  ;;  %449 = vmatpush.msra.mxu3 %v922_v14 }
  0x16   :  { %362 = vmatpush.bf16.msra.mxu0 %v680_v27  ;;  %v116_v0 = vor.u32 %v115_v53, %v113_v52  ;;  %v97_v9 = vshrl.u32 %v56_v54, 16  ;;  %v100_v13 = vshll.u32 %v56_v54, 16  ;;  %v83_v17 = vshrl.u32 %v54_v2, 16  ;;  %v933_v27 = vld [vmem:[%s1019_s2 + $0x48] sm:$0xff]  ;;  %v677_v53 = vld [vmem:[#allocation2 + $0x14] sm:$0xff] }
  0x17   :  { %381 = vmatpush.bf16.msra.mxu1 %v688_v28  ;;  %v72_v6 = vsel %vm882_vm9, %v570_v42, %v71_v59  ;;  %v81_v7 = vsel %vm882_vm9, %v73_v60, %v80_v61  ;;  %v112_v8 = vrot.slane %v111_v62, 4  ;;  %v90_v18 = vrot.slane %v88_v55, 7  ;;  %450 = vmatpush.msra.mxu3 %v933_v27  ;;  %v433_v59 = vld [vmem:[%s1019_s2 + $0x28] sm:$0xff]  ;;  %v432_v60 = vld [vmem:[%s1019_s2 + $0x20] sm:$0xff]  ;;  %v431_v61 = vld [vmem:[%s1019_s2 + $0x18] sm:$0xff] }
  0x18   :  { %400 = vmatpush.bf16.msra.mxu2 %v696_v30  ;;  %v137_v10 = vunpack.c.l.b16 %v72_v6  ;;  %v138_v11 = vunpack.c.l.b16 %v81_v7  ;;  %v117_v12 = vrot.slane %v116_v0, 4  ;;  %v123_v20 = vrot.slane %v88_v55, 4  ;;  %v436_v55 = vld [vmem:[%s1019_s2 + $0x40] sm:$0xff]  ;;  %v430_v62 = vld [vmem:[%s1019_s2 + $0x10] sm:$0xff] }
  0x19   :  { %v114_v16 = vsel %vm901_vm10, %v112_v8, %v113_v52  ;;  %v99_v24 = vrot.slane %v97_v9, 7  ;;  %v124_v26 = vrot.slane %v91_v3, 5  ;;  %v127_v28 = vrot.slane %v100_v13, 5  ;;  %451 = vmatpush.msra.mxu3 %v436_v55  ;;  %v428_v0 = vld [vmem:[%s1019_s2] sm:$0xff] }
  0x1a   :  { %363 = vmatpush.bf16.msra.mxu0 %v679_v40  ;;  %v141_v21 = vpack.c.b16 %v138_v11, %v137_v10  ;;  %v122_v22 = vsel %vm901_vm10, %v117_v12, %v121_v1  ;;  %v157_v23 = vunpack.c.l.b16 %v114_v16  ;;  %v129_v29 = vrot.slane %v97_v9, 4 }
  0x1b   :  { %382 = vmatpush.bf16.msra.mxu1 %v687_v41  ;;  %v158_v25 = vunpack.c.l.b16 %v122_v22  ;;  %v133_v30 = vshll.u32 %v105_v19, 16  ;;  %v571_v33 = vrot.slane %v83_v17, 11  ;;  %v125_v34 = vor.u32 %v124_v26, %v123_v20 }
  0x1c   :  { %401 = vmatpush.bf16.msra.mxu2 %v695_v45  ;;  %v93_v36 = vor.u32 %v91_v3, %v90_v18  ;;  %v95_v37 = vrot.slane %v90_v18, 4  ;;  %v102_v38 = vor.u32 %v100_v13, %v99_v24  ;;  %v130_v39 = vor.u32 %v129_v29, %v127_v28 }
  0x1d   :  { %v161_v31 = vpack.c.b16 %v158_v25, %v157_v23  ;;  %v126_v40 = vrot.slane %v125_v34, 4  ;;  %v135_v42 = vrot.slane %v133_v30, 5 }
  0x1e   :  { %364 = vmatpush.bf16.msra.mxu0 %v678_v57  ;;  %v131_v41 = vrot.slane %v130_v39, 4  ;;  %v94_v43 = vsel %vm882_vm9, %v571_v33, %v93_v36  ;;  %v103_v44 = vsel %vm882_vm9, %v95_v37, %v102_v38  ;;  %v435_v57 = vld [vmem:[%s1019_s2 + $0x38] sm:$0xff] }
  0x1f   :  { %383 = vmatpush.bf16.msra.mxu1 %v686_v58  ;;  %v128_v45 = vsel %vm901_vm10, %v126_v40, %v127_v28  ;;  %v139_v47 = vunpack.c.l.b16 %v94_v43  ;;  %v140_v48 = vunpack.c.l.b16 %v103_v44  ;;  %452 = vmatpush.msra.mxu3 %v435_v57  ;;  %v434_v58 = vld [vmem:[%s1019_s2 + $0x30] sm:$0xff] }
  0x20   :  { %402 = vmatpush.bf16.msra.mxu2 %v694_v5  ;;  %v136_v46 = vsel %vm901_vm10, %v131_v41, %v135_v42  ;;  %v159_v49 = vunpack.c.l.b16 %v128_v45 }
  0x21   :  { %365 = vmatmul.bf16.vlgmr.msra.gmra.mxu0 %v141_v21  ;;  %v160_v51 = vunpack.c.l.b16 %v136_v46  ;;  %v142_v52 = vpack.c.b16 %v140_v48, %v139_v47  ;;  %453 = vmatpush.msra.mxu3 %v434_v58 }
  0x22   :  { %491 = vmatpush.msrb.mxu0 %v855_v32  ;;  %384 = vmatmul.bf16.vlgmr.msra.gmra.mxu1 %v676_v15 }
  0x23   :  { %702 = vmatpush.msrb.mxu1 %v855_v32  ;;  %403 = vmatmul.bf16.vlgmr.msra.gmra.mxu2 %v161_v31  ;;  %v162_v54 = vpack.c.b16 %v160_v51, %v159_v49 }
  0x24   :  { %703 = vmatpush.msrb.mxu2 %v855_v32  ;;  %492 = vmatpush.msrb.mxu0 %v861_v35 }
  0x25   :  { %705 = vmatpush.msrb.mxu1 %v861_v35  ;;  %454 = vmatpush.msra.mxu3 %v433_v59 }
  0x26   :  { %706 = vmatpush.msrb.mxu2 %v861_v35  ;;  %493 = vmatpush.msrb.mxu0 %v878_v50 }
  0x27   :  { %708 = vmatpush.msrb.mxu1 %v878_v50  ;;  %455 = vmatpush.msra.mxu3 %v432_v60 }
  0x28   :  { %709 = vmatpush.msrb.mxu2 %v878_v50  ;;  %494 = vmatpush.msrb.mxu0 %v890_v56 }
  0x29   :  { %711 = vmatpush.msrb.mxu1 %v890_v56  ;;  %456 = vmatpush.msra.mxu3 %v431_v61 }
  0x2a   :  { %712 = vmatpush.msrb.mxu2 %v890_v56  ;;  %495 = vmatpush.msrb.mxu0 %v909_v4 }
  0x2b   :  { %714 = vmatpush.msrb.mxu1 %v909_v4  ;;  %457 = vmatpush.msra.mxu3 %v430_v62 }
  0x2c   :  { %715 = vmatpush.msrb.mxu2 %v909_v4  ;;  %496 = vmatpush.msrb.mxu0 %v922_v14 }
  0x2d   :  { %717 = vmatpush.msrb.mxu1 %v922_v14  ;;  %458 = vmatpush.msra.mxu3 %v429_v63 }
  0x2e   :  { %718 = vmatpush.msrb.mxu2 %v922_v14  ;;  %497 = vmatpush.msrb.mxu0 %v933_v27 }
  0x2f   :  { %720 = vmatpush.msrb.mxu1 %v933_v27  ;;  %459 = vmatpush.msra.mxu3 %v428_v0 }
  0x30   :  { %721 = vmatpush.msrb.mxu2 %v933_v27  ;;  %498 = vmatpush.msrb.mxu0 %v436_v55 }
  0x31   :  { %370 = vmatmul.bf16.gmra.mxu0 %v142_v52  ;;  %723 = vmatpush.msrb.mxu1 %v436_v55 }
  0x32   :  { %389 = vmatmul.bf16.gmra.mxu1 %v677_v53  ;;  %724 = vmatpush.msrb.mxu2 %v436_v55 }
  0x33   :  { %408 = vmatmul.bf16.gmra.mxu2 %v162_v54  ;;  %499 = vmatpush.msrb.mxu0 %v435_v57 }
  0x34   :  { %727 = vmatpush.msrb.mxu2 %v435_v57  ;;  %726 = vmatpush.msrb.mxu1 %v435_v57 }
  0x35   :  { %500 = vmatpush.msrb.mxu0 %v434_v58  ;;  %704 = vmatpush.msrb.mxu3 %v855_v32 }
  0x36   :  { %730 = vmatpush.msrb.mxu2 %v434_v58  ;;  %729 = vmatpush.msrb.mxu1 %v434_v58 }
  0x37   :  { %501 = vmatpush.msrb.mxu0 %v433_v59  ;;  %707 = vmatpush.msrb.mxu3 %v861_v35 }
  0x38   :  { %733 = vmatpush.msrb.mxu2 %v433_v59  ;;  %732 = vmatpush.msrb.mxu1 %v433_v59 }
  0x39   :  { %502 = vmatpush.msrb.mxu0 %v432_v60  ;;  %710 = vmatpush.msrb.mxu3 %v878_v50 }
  0x3a   :  { %736 = vmatpush.msrb.mxu2 %v432_v60  ;;  %735 = vmatpush.msrb.mxu1 %v432_v60 }
  0x3b   :  { %503 = vmatpush.msrb.mxu0 %v431_v61  ;;  %713 = vmatpush.msrb.mxu3 %v890_v56 }
  0x3c   :  { %739 = vmatpush.msrb.mxu2 %v431_v61  ;;  %738 = vmatpush.msrb.mxu1 %v431_v61 }
  0x3d   :  { %504 = vmatpush.msrb.mxu0 %v430_v62  ;;  %716 = vmatpush.msrb.mxu3 %v909_v4 }
  0x3e   :  { %742 = vmatpush.msrb.mxu2 %v430_v62  ;;  %741 = vmatpush.msrb.mxu1 %v430_v62 }
  0x3f   :  { %505 = vmatpush.msrb.mxu0 %v429_v63  ;;  %719 = vmatpush.msrb.mxu3 %v922_v14 }
  0x40   :  { %745 = vmatpush.msrb.mxu2 %v429_v63  ;;  %744 = vmatpush.msrb.mxu1 %v429_v63 }
  0x41   :  { %506 = vmatpush.msrb.mxu0 %v428_v0  ;;  %722 = vmatpush.msrb.mxu3 %v933_v27 }
  0x42   :  { %748 = vmatpush.msrb.mxu2 %v428_v0  ;;  %747 = vmatpush.msrb.mxu1 %v428_v0 }
  0x43   :  { %725 = vmatpush.msrb.mxu3 %v436_v55 }
  0x45   :  { %728 = vmatpush.msrb.mxu3 %v435_v57 }
  0x47   :  { %731 = vmatpush.msrb.mxu3 %v434_v58 }
  0x49   :  { %734 = vmatpush.msrb.mxu3 %v433_v59 }
  0x4b   :  { %737 = vmatpush.msrb.mxu3 %v432_v60 }
  0x4d   :  { %740 = vmatpush.msrb.mxu3 %v431_v61 }
  0x4f   :  { %743 = vmatpush.msrb.mxu3 %v430_v62 }
  0x51   :  { %746 = vmatpush.msrb.mxu3 %v429_v63  ;;  %v530_v63 = vld [vmem:[%s1021_s3] sm:$0x1] }
  0x53   :  { %749 = vmatpush.msrb.mxu3 %v428_v0 }
  0x9e   :  { %v366_v1 = vpop.f32.mrf.mxu0 }
  0x9f   :  { %v385_v32 = vpop.f32.mrf.mxu1 }
  0xa0   :  { %v386_v2 = vadd.f32 %v385_v32, %v366_v1 }
  0xa6   :  { %v404_v35 = vpop.f32.mrf.mxu2  ;;  %v368_v50 = vpop.f32.mrf.mxu0 }
  0xa7   :  { %v405_v56 = vadd.f32 %v404_v35, %v386_v2  ;;  %v387_v3 = vpop.f32.mrf.mxu1  ;;  %v750_v35 = vld [vmem:[%s1020_s4] ss:$0 sm:$0xff] }
  0xa8   :  { %v388_v4 = vadd.f32 %v387_v3, %v368_v50 }
  0xa9   :  { %460 = vmatmul.f32.vlgmr.msra.gmra.mxu3 %v405_v56 }
  0xae   :  { %v406_v5 = vpop.f32.mrf.mxu2  ;;  %v371_v7 = vpop.f32.mrf.mxu0 }
  0xaf   :  { %v407_v6 = vadd.f32 %v406_v5, %v388_v4  ;;  %v390_v8 = vpop.f32.mrf.mxu1 }
  0xb0   :  { %v391_v9 = vadd.f32 %v390_v8, %v371_v7 }
  0xb1   :  { %463 = vmatmul.f32.gmra.mxu3 %v407_v6 }
  0xb6   :  { %v409_v10 = vpop.f32.mrf.mxu2  ;;  %v373_v12 = vpop.f32.mrf.mxu0 }
  0xb7   :  { %v410_v11 = vadd.f32 %v409_v10, %v391_v9  ;;  %v392_v13 = vpop.f32.mrf.mxu1 }
  0xb8   :  { %v393_v14 = vadd.f32 %v392_v13, %v373_v12 }
  0xb9   :  { %466 = vmatmul.f32.gmra.mxu3 %v410_v11 }
  0xbe   :  { %v411_v15 = vpop.f32.mrf.mxu2 }
  0xbf   :  { %v412_v16 = vadd.f32 %v411_v15, %v393_v14 }
  0xc1   :  { %469 = vmatmul.f32.gmra.mxu3 %v412_v16 }
 0x12c   :  { %v461_v17 = vpop.f32.mrf.mxu3 }
 0x134   :  { %v464_v18 = vpop.f32.mrf.mxu3 }
 0x135   :  { %v473_v20 = vadd.f32 %v464_v18, %v461_v17 }
 0x13c   :  { %v467_v19 = vpop.f32.mrf.mxu3 }
 0x13d   :  { %v474_v21 = vadd.f32 %v473_v20, %v467_v19 }
 0x144   :  { %v470_v22 = vpop.f32.mrf.mxu3 }
 0x145   :  { %v475_v23 = vadd.f32 %v474_v21, %v470_v22 }
 0x147   :  { %v476_v24 = vrot.slane %v475_v23, 4 }
 0x149   :  { %v477_v25 = vadd.f32 %v476_v24, %v475_v23 }
 0x14b   :  { %v478_v26 = vrot.slane %v477_v25, 2 }
 0x14d   :  { %v479_v27 = vadd.f32 %v478_v26, %v477_v25 }
 0x14f   :  { %v480_v28 = vrot.slane %v479_v27, 1 }
 0x151   :  { %v481_v29 = vadd.f32 %v480_v28, %v479_v27 }
 0x153   :  { %v482_v30 = vmul.f32 0.001953125, %v481_v29 }
 0x155   :  { %v483_v31 = vsub.f32 %v405_v56, %v482_v30  ;;  %v484_v33 = vsub.f32 %v407_v6, %v482_v30  ;;  %v485_v34 = vsub.f32 %v410_v11, %v482_v30  ;;  %v486_v36 = vsub.f32 %v412_v16, %v482_v30 }
 0x157   :  { %v487_v37 = vmul.f32 %v483_v31, %v483_v31  ;;  %v488_v38 = vmul.f32 %v484_v33, %v484_v33  ;;  %v489_v39 = vmul.f32 %v485_v34, %v485_v34  ;;  %v490_v40 = vmul.f32 %v486_v36, %v486_v36 }
 0x159   :  { %507 = vmatmul.f32.vlgmr.msrb.gmra.mxu0 %v487_v37  ;;  %510 = vmatmul.f32.vlgmr.msrb.gmra.mxu1 %v488_v38 }
 0x15a   :  { %513 = vmatmul.f32.vlgmr.msrb.gmra.mxu2 %v489_v39  ;;  %516 = vmatmul.f32.vlgmr.msrb.gmra.mxu3 %v490_v40 }
 0x1d6   :  { %v508_v41 = vpop.f32.mrf.mxu0  ;;  %v511_v42 = vpop.f32.mrf.mxu1 }
 0x1d7   :  { %v520_v43 = vadd.f32 %v511_v42, %v508_v41 }
 0x1dd   :  { %v514_v44 = vpop.f32.mrf.mxu2  ;;  %v517_v46 = vpop.f32.mrf.mxu3 }
 0x1de   :  { %v521_v45 = vadd.f32 %v520_v43, %v514_v44 }
 0x1e0   :  { %v522_v47 = vadd.f32 %v521_v45, %v517_v46 }
 0x1e2   :  { %v523_v48 = vrot.slane %v522_v47, 4 }
 0x1e4   :  { %v524_v49 = vadd.f32 %v523_v48, %v522_v47 }
 0x1e6   :  { %v525_v51 = vrot.slane %v524_v49, 2 }
 0x1e8   :  { %v526_v52 = vadd.f32 %v525_v51, %v524_v49 }
 0x1ea   :  { %v527_v53 = vrot.slane %v526_v52, 1 }
 0x1ec   :  { %v528_v54 = vadd.f32 %v527_v53, %v526_v52 }
 0x1ee   :  { %v529_v55 = vmul.f32 0.001953125, %v528_v54 }
 0x1f0   :  { %v531_v57 = vadd.f32 1e-05, %v529_v55 }
 0x1f2   :  { %751 = vrsqrt.f32 %v531_v57  ;;  %vm538_vm12 = vweird.f32 %v531_v57 }
 0x1f8   :  { %v752_v58 = vpop.eup %751 }
 0x1f9   :  { %v533_v59 = vmul.f32 %v752_v58, %v531_v57  ;;  %vm539_vm11 = vweird.f32 %v752_v58 }
 0x1fa   :  { %vm540_vm13 = vmor %vm538_vm12, %vm539_vm11 }
 0x1fb   :  { %v534_v60 = vmul.f32 %v752_v58, %v533_v59 }
 0x1fd   :  { %v535_v61 = vmul.f32 0.5, %v534_v60 }
 0x1ff   :  { %v536_v62 = vsub.f32 1.5, %v535_v61 }
 0x201   :  { %v537_v0 = vmul.f32 %v752_v58, %v536_v62 }
 0x203   :  { %v541_v1 = vsel %vm540_vm13, %v752_v58, %v537_v0 }
 0x204   :  { %v542_v32 = vmul.f32 %v541_v1, %v530_v63 }
 0x206   :  { %v544_v2 = vperm.slane %v542_v32, 0 }
 0x208   :  { %v546_v50 = vmul.f32 %v544_v2, %v483_v31  ;;  %v547_v56 = vmul.f32 %v544_v2, %v484_v33  ;;  %v548_v3 = vmul.f32 %v544_v2, %v485_v34  ;;  %v549_v4 = vmul.f32 %v544_v2, %v486_v36 }
 0x20a   :  { %v554_v5 = vadd.f32 %v750_v35, %v546_v50  ;;  %v555_v6 = vadd.f32 %v750_v35, %v547_v56  ;;  %v556_v7 = vadd.f32 %v750_v35, %v548_v3  ;;  %v557_v8 = vadd.f32 %v750_v35, %v549_v4 }
 0x20c   :  { %v558_v9 = vmax.f32 %v554_v5, 0.0  ;;  %v559_v10 = vmax.f32 %v555_v6, 0.0  ;;  %v560_v11 = vmax.f32 %v556_v7, 0.0  ;;  %v561_v12 = vmax.f32 %v557_v8, 0.0 }
 0x20e   :  { %562 = vst [vmem:[%s1022_s5] sm:$0xff] %v558_v9 }
 0x20f   :  { %563 = vst [vmem:[%s1022_s5 + $0x8] sm:$0xff] %v559_v10 }
 0x210   :  { %564 = vst [vmem:[%s1022_s5 + $0x10] sm:$0xff] %v560_v11 }
 0x211   :  { %565 = vst [vmem:[%s1022_s5 + $0x18] sm:$0xff] %v561_v12 }

</bundles_post_ra>
